<compile_context>
chip_gen: v7x
topology: tpu7x:2x2x1
jax: 0.10.0
libtpu: 0.0.40
codegen_flags: <defaults>
</compile_context>

<pallas_src>
import jax
import jax.numpy as jnp
from jax import lax
from jax.experimental import pallas as pl
from jax.experimental.pallas import tpu as pltpu


def graphsage_kernel(mfeat_ref, ufeat_ref, wenc_ref, wclsm_ref, wclsu_ref,
                     me_ref, ue_ref, sc_ref):
    mfeat = mfeat_ref[...]        # (tile_n, F)   bf16
    ufeat = ufeat_ref[...]        # (tile_n, F)   bf16
    wenc = wenc_ref[...]          # (D, F)        bf16
    wcls_m = wclsm_ref[...]       # (C, D)        f32
    wcls_u = wclsu_ref[...]       # (C, D)        f32

    # enc(nodes): relu(W_enc @ feats^T) -> (D, tile_n), expressed without any
    # explicit transpose by contracting the feature axis of both operands.
    dn_feat = (((1,), (1,)), ((), ()))
    movie_embeds = jnp.maximum(
        lax.dot_general(wenc, mfeat, dn_feat,
                        preferred_element_type=jnp.float32), 0.0)
    user_embeds = jnp.maximum(
        lax.dot_general(wenc, ufeat, dn_feat,
                        preferred_element_type=jnp.float32), 0.0)

    # scores = (weight.mm(cat([me, ue], 0))).t() computed directly in
    # (tile_n, C) layout as two accumulated dots over the split weight halves
    # (no concat, no transpose): contract embed_dim (axis 0 of embeds with
    # axis 1 of the weight half).
    dn_embed = (((0,), (1,)), ((), ()))
    scores = (lax.dot_general(movie_embeds, wcls_m, dn_embed,
                              preferred_element_type=jnp.float32) +
              lax.dot_general(user_embeds, wcls_u, dn_embed,
                              preferred_element_type=jnp.float32))

    me_ref[...] = movie_embeds.astype(me_ref.dtype)
    ue_ref[...] = user_embeds.astype(ue_ref.dtype)
    sc_ref[...] = scores.astype(sc_ref.dtype)


def supervised_graphsage_forward(movie_feats, user_feats, w_enc, w_cls, *,
                                 tile_n=128, compute_dtype=jnp.bfloat16):
    N, F = movie_feats.shape
    D = w_enc.shape[0]
    C = w_cls.shape[0]
    assert w_cls.shape[1] == 2 * D
    assert N % tile_n == 0, "node count must be a multiple of tile_n"

    # bf16 feature / encoder-weight traffic (dominant HBM bytes); f32 accum.
    mf = movie_feats.astype(compute_dtype)
    uf = user_feats.astype(compute_dtype)
    we = w_enc.astype(compute_dtype)
    # Static split of the classifier weight — replaces the in-kernel concat.
    wcls_m = w_cls[:, :D].astype(jnp.float32)
    wcls_u = w_cls[:, D:].astype(jnp.float32)

    grid = (N // tile_n,)

    out_shapes = (
        jax.ShapeDtypeStruct((D, N), jnp.float32),   # movie_embeds
        jax.ShapeDtypeStruct((D, N), jnp.float32),   # user_embeds
        jax.ShapeDtypeStruct((N, C), jnp.float32),   # scores
    )

    return pl.pallas_call(
        graphsage_kernel,
        out_shape=out_shapes,
        grid_spec=pltpu.PrefetchScalarGridSpec(
            num_scalar_prefetch=0,
            grid=grid,
            in_specs=[
                pl.BlockSpec((tile_n, F), lambda i: (i, 0)),   # movie feats tile
                pl.BlockSpec((tile_n, F), lambda i: (i, 0)),   # user feats tile
                pl.BlockSpec((D, F), lambda i: (0, 0)),        # w_enc (resident)
                pl.BlockSpec((C, D), lambda i: (0, 0)),        # w_cls movie half
                pl.BlockSpec((C, D), lambda i: (0, 0)),        # w_cls user half
            ],
            out_specs=[
                pl.BlockSpec((D, tile_n), lambda i: (0, i)),   # lane-dense embeds
                pl.BlockSpec((D, tile_n), lambda i: (0, i)),
                pl.BlockSpec((tile_n, C), lambda i: (i, 0)),   # scores
            ],
        ),
        compiler_params=pltpu.CompilerParams(
            dimension_semantics=("parallel",)),
    )(mf, uf, we, wcls_m, wcls_u)


def reference_forward(movie_feats, user_feats, w_enc, w_cls,
                      compute_dtype=jnp.bfloat16):
    D = w_enc.shape[0]
    mf = movie_feats.astype(compute_dtype)
    uf = user_feats.astype(compute_dtype)
    we = w_enc.astype(compute_dtype)
    dn = (((1,), (1,)), ((), ()))
    me = jnp.maximum(lax.dot_general(we, mf, dn,
                                     preferred_element_type=jnp.float32), 0.0)
    ue = jnp.maximum(lax.dot_general(we, uf, dn,
                                     preferred_element_type=jnp.float32), 0.0)
    merge = jnp.concatenate([me, ue], axis=0)               # (2D, N)
    scores = (w_cls.astype(jnp.float32) @ merge).T           # (N, C)
    return me, ue, scores


if __name__ == "__main__":
    # Small shapes consistent with the module: N nodes per side, feat dim F,
    # encoder embed_dim D, num_classes C (ratings 1..5).  N is a multiple of
    # the 128-wide node tile so the grid has >1 step (exercises pipelining).
    N, F, D, C = 256, 128, 64, 5
    TILE_N = 128

    key = jax.random.PRNGKey(0)
    k1, k2, k3, k4 = jax.random.split(key, 4)

    movie_feats = jax.random.normal(k1, (N, F), dtype=jnp.float32)
    user_feats = jax.random.normal(k2, (N, F), dtype=jnp.float32)
    w_enc = jax.random.normal(k3, (D, F), dtype=jnp.float32) * 0.05

    # xavier_uniform_ for weight of shape (num_classes, 2*embed_dim)
    fan_in, fan_out = 2 * D, C
    bound = (6.0 / (fan_in + fan_out)) ** 0.5
    w_cls = jax.random.uniform(k4, (C, 2 * D), dtype=jnp.float32,
                               minval=-bound, maxval=bound)

    me, ue, scores = supervised_graphsage_forward(
        movie_feats, user_feats, w_enc, w_cls, tile_n=TILE_N)
    jax.block_until_ready((me, ue, scores))

    me_r, ue_r, sc_r = reference_forward(movie_feats, user_feats, w_enc, w_cls)
    assert me.shape == (D, N) and ue.shape == (D, N) and scores.shape == (N, C)
    assert jnp.allclose(me, me_r, atol=1e-3, rtol=1e-3)
    assert jnp.allclose(ue, ue_r, atol=1e-3, rtol=1e-3)
    assert jnp.allclose(scores, sc_r, atol=1e-3, rtol=1e-3)

    print("KERNEL_OK")
</pallas_src>

<mosaic_0001>
module attributes {stable_mosaic.version = 11 : i64} {
  func.func @graphsage_kernel(%arg0: i32, %arg1: memref<128x128xbf16, #tpu.memory_space<vmem>>, %arg2: memref<128x128xbf16, #tpu.memory_space<vmem>>, %arg3: memref<64x128xbf16, #tpu.memory_space<vmem>>, %arg4: memref<5x64xf32, #tpu.memory_space<vmem>>, %arg5: memref<5x64xf32, #tpu.memory_space<vmem>>, %arg6: memref<64x128xf32, #tpu.memory_space<vmem>>, %arg7: memref<64x128xf32, #tpu.memory_space<vmem>>, %arg8: memref<128x5xf32, #tpu.memory_space<vmem>>) attributes {dimension_semantics = [#tpu.dimension_semantics<parallel>], iteration_bounds = array<i64: 2>, scalar_prefetch = 0 : i64, scratch_operands = 0 : i64, tpu.core_type = #tpu.core_type<tc>, window_params = [{transform_indices = @transform_0, window_bounds = array<i64: 128, 128>}, {transform_indices = @transform_1, window_bounds = array<i64: 128, 128>}, {pipeline_mode = #tpu.pipeline_mode<synchronous>, transform_indices = @transform_2, window_bounds = array<i64: 64, 128>}, {pipeline_mode = #tpu.pipeline_mode<synchronous>, transform_indices = @transform_3, window_bounds = array<i64: 5, 64>}, {pipeline_mode = #tpu.pipeline_mode<synchronous>, transform_indices = @transform_4, window_bounds = array<i64: 5, 64>}, {transform_indices = @transform_5, window_bounds = array<i64: 64, 128>}, {transform_indices = @transform_6, window_bounds = array<i64: 64, 128>}, {transform_indices = @transform_7, window_bounds = array<i64: 128, 5>}]} {
    %c0 = arith.constant 0 : index
    %c0_0 = arith.constant 0 : index
    %0 = vector.load %arg1[%c0, %c0_0] : memref<128x128xbf16, #tpu.memory_space<vmem>>, vector<128x128xbf16>
    %c0_1 = arith.constant 0 : index
    %c0_2 = arith.constant 0 : index
    %1 = vector.load %arg2[%c0_1, %c0_2] : memref<128x128xbf16, #tpu.memory_space<vmem>>, vector<128x128xbf16>
    %c0_3 = arith.constant 0 : index
    %c0_4 = arith.constant 0 : index
    %2 = vector.load %arg3[%c0_3, %c0_4] : memref<64x128xbf16, #tpu.memory_space<vmem>>, vector<64x128xbf16>
    %c0_5 = arith.constant 0 : index
    %c0_6 = arith.constant 0 : index
    %3 = vector.load %arg4[%c0_5, %c0_6] : memref<5x64xf32, #tpu.memory_space<vmem>>, vector<5x64xf32>
    %c0_7 = arith.constant 0 : index
    %c0_8 = arith.constant 0 : index
    %4 = vector.load %arg5[%c0_7, %c0_8] : memref<5x64xf32, #tpu.memory_space<vmem>>, vector<5x64xf32>
    %cst = arith.constant dense<0.000000e+00> : vector<64x128xf32>
    %5 = tpu.matmul %2, %0, %cst {dimension_numbers = #tpu.dot_dimension_numbers<[1], [1], [0], [0], [0, 0, 1, 0], [], []>} : vector<64x128xbf16>, vector<128x128xbf16>, vector<64x128xf32> -> vector<64x128xf32>
    %cst_9 = arith.constant 0.000000e+00 : f32
    %6 = vector.broadcast %cst_9 : f32 to vector<64x128xf32>
    %7 = arith.maximumf %5, %6 : vector<64x128xf32>
    %cst_10 = arith.constant dense<0.000000e+00> : vector<64x128xf32>
    %8 = tpu.matmul %2, %1, %cst_10 {dimension_numbers = #tpu.dot_dimension_numbers<[1], [1], [0], [0], [0, 0, 1, 0], [], []>} : vector<64x128xbf16>, vector<128x128xbf16>, vector<64x128xf32> -> vector<64x128xf32>
    %cst_11 = arith.constant 0.000000e+00 : f32
    %9 = vector.broadcast %cst_11 : f32 to vector<64x128xf32>
    %10 = arith.maximumf %8, %9 : vector<64x128xf32>
    %cst_12 = arith.constant dense<0.000000e+00> : vector<128x5xf32>
    %11 = tpu.matmul %7, %3, %cst_12 {dimension_numbers = #tpu.dot_dimension_numbers<[0], [1], [1], [0], [0, 1, 1, 0], [], []>} : vector<64x128xf32>, vector<5x64xf32>, vector<128x5xf32> -> vector<128x5xf32>
    %cst_13 = arith.constant dense<0.000000e+00> : vector<128x5xf32>
    %12 = tpu.matmul %10, %4, %cst_13 {dimension_numbers = #tpu.dot_dimension_numbers<[0], [1], [1], [0], [0, 1, 1, 0], [], []>} : vector<64x128xf32>, vector<5x64xf32>, vector<128x5xf32> -> vector<128x5xf32>
    %13 = arith.addf %11, %12 : vector<128x5xf32>
    %c0_14 = arith.constant 0 : index
    %c0_15 = arith.constant 0 : index
    %14 = vector.load %arg6[%c0_14, %c0_15] : memref<64x128xf32, #tpu.memory_space<vmem>>, vector<64x128xf32>
    tpu.vector_store %arg6[%c0_14, %c0_15], %7 {strides = array<i32>} : memref<64x128xf32, #tpu.memory_space<vmem>>, vector<64x128xf32>,
    %c0_16 = arith.constant 0 : index
    %c0_17 = arith.constant 0 : index
    %15 = vector.load %arg7[%c0_16, %c0_17] : memref<64x128xf32, #tpu.memory_space<vmem>>, vector<64x128xf32>
    tpu.vector_store %arg7[%c0_16, %c0_17], %10 {strides = array<i32>} : memref<64x128xf32, #tpu.memory_space<vmem>>, vector<64x128xf32>,
    %c0_18 = arith.constant 0 : index
    %c0_19 = arith.constant 0 : index
    %16 = vector.load %arg8[%c0_18, %c0_19] : memref<128x5xf32, #tpu.memory_space<vmem>>, vector<128x5xf32>
    tpu.vector_store %arg8[%c0_18, %c0_19], %13 {strides = array<i32>} : memref<128x5xf32, #tpu.memory_space<vmem>>, vector<128x5xf32>,
    return
  }
  func.func @transform_0(%arg0: i32) -> (i32, i32) {
    %c0_i32 = arith.constant 0 : i32
    %c0_i32_0 = arith.constant 0 : i32
    return %arg0, %c0_i32 : i32, i32
  }
  func.func @transform_1(%arg0: i32) -> (i32, i32) {
    %c0_i32 = arith.constant 0 : i32
    %c0_i32_0 = arith.constant 0 : i32
    return %arg0, %c0_i32 : i32, i32
  }
  func.func @transform_2(%arg0: i32) -> (i32, i32) {
    %c0_i32 = arith.constant 0 : i32
    %c0_i32_0 = arith.constant 0 : i32
    %c0_i32_1 = arith.constant 0 : i32
    return %c0_i32, %c0_i32_0 : i32, i32
  }
  func.func @transform_3(%arg0: i32) -> (i32, i32) {
    %c0_i32 = arith.constant 0 : i32
    %c0_i32_0 = arith.constant 0 : i32
    %c0_i32_1 = arith.constant 0 : i32
    return %c0_i32, %c0_i32_0 : i32, i32
  }
  func.func @transform_4(%arg0: i32) -> (i32, i32) {
    %c0_i32 = arith.constant 0 : i32
    %c0_i32_0 = arith.constant 0 : i32
    %c0_i32_1 = arith.constant 0 : i32
    return %c0_i32, %c0_i32_0 : i32, i32
  }
  func.func @transform_5(%arg0: i32) -> (i32, i32) {
    %c0_i32 = arith.constant 0 : i32
    %c0_i32_0 = arith.constant 0 : i32
    return %c0_i32, %arg0 : i32, i32
  }
  func.func @transform_6(%arg0: i32) -> (i32, i32) {
    %c0_i32 = arith.constant 0 : i32
    %c0_i32_0 = arith.constant 0 : i32
    return %c0_i32, %arg0 : i32, i32
  }
  func.func @transform_7(%arg0: i32) -> (i32, i32) {
    %c0_i32 = arith.constant 0 : i32
    %c0_i32_0 = arith.constant 0 : i32
    return %arg0, %c0_i32 : i32, i32
  }
}

</mosaic_0001>

<bundles_post_ra>
// kernel: tpu_custom_call.1
= control target key start
LH: loop header
LB: loop body
LE: loop exit
PB: predicated region body
PF: predicated region fallthrough
CT: control target
= control target key end

     0   :  { %s2496_s0 = inlined_call_operand.hbm [shape: bf16[256,128], index: 0, kind: input, shape index: {}]   ;;  %s2497_s1 = inlined_call_operand.hbm [shape: bf16[256,128], index: 1, kind: input, shape index: {}]   ;;  %s2498_s2 = inlined_call_operand.hbm [shape: bf16[64,128], index: 2, kind: input, shape index: {}]   ;;  %s2499_s3 = inlined_call_operand.vmem [shape: f32[5,64], index: 3, kind: input, shape index: {}]   ;;  %s2500_s4 = inlined_call_operand.hbm [shape: f32[5,64], index: 4, kind: input, shape index: {}]   ;;  %s2501_s5 = inlined_call_operand.hbm [shape: f32[64,256], index: 5, kind: output, shape index: {0}]   ;;  %s2502_s6 = inlined_call_operand.hbm [shape: f32[64,256], index: 6, kind: output, shape index: {1}]   ;;  %s2503_s7 = inlined_call_operand.vmem [shape: f32[256,5], index: 7, kind: output, shape index: {2}]  }
   0x1   :  { %2511 = sst [smem:[#allocation20_spill]] %s2496_s0 }
   0x2   :  { %2512 = sst [smem:[#allocation21_spill]] %s2498_s2 }
   0x3   :  { %2513 = sst [smem:[#allocation22_spill]] %s2500_s4 }
   0x4   :  { %13 = vsyncpa [#allocation3], 0 }
   0x5   :  { %15 = vsyncpa [#allocation3 + $0x1], 0 }
   0x6   :  { %16 = vsyncpa [#allocation6], 0 }
   0x7   :  { %18 = vsyncpa [#allocation6 + $0x1], 0 }
   0x8   :  { %19 = vsyncpa [#allocation9], 0 }
   0x9   :  { %20 = vsyncpa [#allocation4], 0 }
   0xa   :  { %22 = vsyncpa [#allocation4 + $0x1], 0 }
   0xb   :  { %23 = vsyncpa [#allocation12], 0 }
   0xc   :  { %25 = vsyncpa [#allocation12 + $0x1], 0  ;;  %s2041_s24 = smov 0   ;;  %s2043_s25 = smov 0  }
   0xd   :  { %s2045_s26 = smov 0   ;;  %s2047_s27 = smov 0  }
   0xe LB: > { %s2062_s28 = sadd.s32 4294967295, %s1988_s27   ;;  %s1403_s29 = sadd.s32 4294967294, %s1988_s27   ;;  %s1988_s27 = sphi %s2047_s27, %s2539_s27   ;;  %s1984_s26 = sphi %s2045_s26, %s2538_s26   ;;  %s1980_s25 = sphi %s2043_s25, %s2537_s25   ;;  %s1976_s24 = sphi %s2041_s24, %s2536_s24  }
   0xf   : > { %p51_p0 = scmp.ne.s32.totalorder %s1980_s25, %s1976_s24  ;;  %p2504_p1 = scmp.eq.s32.totalorder %s2062_s28, 0 }
  0x10   : > { %p170_p3 = scmp.eq.s32.totalorder %s1403_s29, 1  ;;  %p1404_p5 = scmp.ge.s32.totalorder %s1988_s27, 1 }
  0x11   : > { %p2071_p4 = por %p2504_p1, %p51_p0  ;;  %p229_p7 = scmp.lt.s32.totalorder %s1988_s27, 3 }
  0x12   : > { %p2076_p6 = por %p170_p3, %p51_p0  ;;  %s1990_s10 = smov [#allocation7]  }
  0x13   : > { %s2514_s30 = scalar_select %p2071_p4, 1, 0 }
  0x14   : > { %s2515_s8 = scalar_select %p2076_p6, 1, 0 }
  0x15   : > { %p2081_p8 = pnand %p1404_p5, %p229_p7  ;;  %s241_s11 = sshll.u32 %s1990_s10, 4  ;;  %s2085_s11 = int_to_ptr.vmem [resolvable:$true] %s241_s11 }
  0x16   : > { %s1991_s13 = smov [#allocation8]   ;;  %s2518_s2 = sld [smem:[#allocation21_spill]] }
  0x17   : > { %p1675_p9 = pneg %p2081_p8  ;;  %s258_s14 = sshll.u32 %s1991_s13, 4  ;;  %s2096_s14 = int_to_ptr.vmem [resolvable:$true] %s258_s14 }
  0x19   : > { %p2092_p11 = pnand %p1675_p9, %p2504_p1 }
  0x1b   : > { %p1764_p13 = pneg %p2092_p11 }
  0x1c   : > { %s1762_s17 = scalar_lea.hbm %s2518_s2, 512 }
  0x1d   : > { %p1763_p12 = scmp.ne.s32.totalorder %s2518_s2, %s1762_s17  ;;  %p1769_p5 = scmp.lt.u32.totalorder %s1762_s17, %s2518_s2 }
  0x1f   : > { %p1765_p0 = pnand %p1764_p13, %p1763_p12 }
  0x21   : > { %p1766_p3 = pneg %p1765_p0 }
  0x23   : > { %p1771_p7 = pnand %p1769_p5, %p1766_p3 }
  0x25   : > { %1774 = shalt.err (!%p1771_p7)
}
  0x26   : > { %s1775_s22 = scalar_lea.vmem %s2085_s11, 512  ;;  %p1783_p2 = scmp.lt.s32.totalorder %s2085_s11, %s2085_s11 }
  0x27   : > { %p1776_p9 = scmp.ne.s32.totalorder %s2085_s11, %s1775_s22  ;;  %p1784_p12 = scmp.lt.s32.totalorder %s1775_s22, %s1775_s22 }
  0x29   : > { %p1778_p10 = pnand %p1776_p9, %p1764_p13  ;;  %p1785_p0 = por %p1784_p12, %p1783_p2 }
  0x2b   : > { %p1779_p1 = pneg %p1778_p10 }
  0x2d   : > { %p1786_p6 = pnand %p1785_p0, %p1779_p1 }
  0x2f   : > { %1789 = shalt.err (!%p1786_p6)
}
  0x30   : > { %s2505_s23 = smov 64   ;;  %s2507_s29 = smov 4  }
  0x31   : > { %1678 = dma.hbm_to_vmem [thread:$0]  (!%p2092_p11), %s2518_s2, 512, %s2085_s11, [#allocation6], %s2505_s23, %s2505_s23, %s2507_s29  }
  0x32   : > { %s2519_s4 = sld [smem:[#allocation22_spill]] }
  0x38   : > { %s1790_s17 = scalar_lea.hbm %s2519_s4, 128 }
  0x39   : > { %p1791_p1 = scmp.ne.s32.totalorder %s2519_s4, %s1790_s17  ;;  %p1797_p10 = scmp.lt.u32.totalorder %s1790_s17, %s2519_s4 }
  0x3b   : > { %p1793_p2 = pnand %p1791_p1, %p1764_p13 }
  0x3d   : > { %p1794_p6 = pneg %p1793_p2 }
  0x3f   : > { %p1799_p3 = pnand %p1797_p10, %p1794_p6 }
  0x41   : > { %1802 = shalt.err (!%p1799_p3)
}
  0x42   : > { %s1803_s11 = scalar_lea.vmem %s2096_s14, 128  ;;  %p1811_p12 = scmp.lt.s32.totalorder %s2096_s14, %s2096_s14 }
  0x43   : > { %p1804_p5 = scmp.ne.s32.totalorder %s2096_s14, %s1803_s11  ;;  %p1812_p0 = scmp.lt.s32.totalorder %s1803_s11, %s1803_s11 }
  0x45   : > { %p1806_p7 = pnand %p1804_p5, %p1764_p13  ;;  %p1813_p1 = por %p1812_p0, %p1811_p12 }
  0x47   : > { %p1807_p9 = pneg %p1806_p7 }
  0x49   : > { %p1814_p2 = pnand %p1813_p1, %p1807_p9 }
  0x4b   : > { %1817 = shalt.err (!%p1814_p2)
}
  0x4c   : > { %1681 = dma.hbm_to_vmem [thread:$0]  (!%p2092_p11), %s2519_s4, 128, %s2096_s14, [#allocation9]  }
  0x4d   : > { %s2154_s13 = sadd.s32 1, %s1988_s27   ;;  %s38_s12 = sadd.s32 1, %s1984_s26 }
  0x4e   : > { %s35_s15 = ssub.s32 %s1988_s27, %s2154_s13  ;;  %p45_p13 = scmp.ne.s32.totalorder %s1984_s26, %s1980_s25 }
  0x4f   : > { %p36_p6 = scmp.eq.s32.totalorder %s35_s15, 0  ;;  %p46_p10 = scmp.eq.s32.totalorder %s1988_s27, 0 }
  0x50   : > { %p2520_p3 = scmp.eq.s32.totalorder %s2062_s28, 1  ;;  %p1698_p7 = scmp.lt.s32.totalorder %s1988_s27, 2 }
  0x51   : > { %s2170_s17 = scalar_select %p36_p6, %s1984_s26, %s38_s12  }
  0x52   : > { %p2164_p5 = por %p2520_p3, %p45_p13  ;;  %p47_p9 = por %p46_p10, %p45_p13 }
  0x53   : > { %2522 = sst [smem:[#allocation19_spill]] %s2170_s17  ;;  %s269_s18 = sand.u32 1, %s1984_s26  }
  0x54   : > { %s2521_s16 = scalar_select %p2164_p5, 1, 0 }
  0x55   : > { %s1408_s19 = sshll.u32 %s269_s18, 6  ;;  %s1483_s14 = sshll.u32 %s1988_s27, 10 }
  0x56   : > { %s2523_s0 = sld [smem:[#allocation20_spill]]  ;;  %s273_s22 = scalar_lea.vmem [#allocation2], %s1408_s19 }
  0x57   : > { %s280_s10 = sshll.u32 %s273_s22, 4  ;;  %p2181_p11 = pnand %p1698_p7, %p47_p9  ;;  %s2179_s10 = int_to_ptr.vmem [resolvable:$true] %s280_s10 }
  0x58   : > { %s2188_s20 = scalar_lea.hbm %s2497_s1, %s1483_s14  ;;  %s294_s21 = scalar_lea.vmem [#allocation5], %s1408_s19 }
  0x59   : > { %s2190_s29 = sshll.u32 %s294_s21, 4  ;;  %s2192_s2 = scalar_lea.sflag [#allocation3], %s269_s18  ;;  %s2224_s29 = int_to_ptr.vmem [resolvable:$true] %s2190_s29 }
  0x5a   : > { %p1820_p0 = pneg %p2181_p11 }
  0x5c   : > { %s2177_s11 = scalar_lea.hbm %s2523_s0, %s1483_s14  ;;  %s1823_s23 = scalar_lea.hbm %s2523_s0, 2048 }
  0x5d   : > { %s1818_s22 = scalar_lea.hbm %s2177_s11, 1024  ;;  %p1824_p13 = scmp.lt.u32.totalorder %s2177_s11, %s2523_s0 }
  0x5e   : > { %p1819_p12 = scmp.ne.s32.totalorder %s2177_s11, %s1818_s22  ;;  %p1825_p6 = scmp.lt.u32.totalorder %s1823_s23, %s1818_s22 }
  0x5f   : > { %p1827_p3 = scmp.lt.u32.totalorder %s1818_s22, %s2177_s11 }
  0x60   : > { %p1821_p1 = pnand %p1820_p0, %p1819_p12  ;;  %p1826_p10 = por %p1825_p6, %p1824_p13 }
  0x62   : > { %p1822_p2 = pneg %p1821_p1  ;;  %p1828_p7 = por %p1827_p3, %p1826_p10 }
  0x64   : > { %p1829_p9 = pnand %p1828_p7, %p1822_p2 }
  0x66   : > { %1832 = shalt.err (!%p1829_p9)
}
  0x67   : > { %s1833_s18 = scalar_lea.vmem %s2179_s10, 1024  ;;  %s1994_s4 = smov [#allocation2]  }
  0x68   : > { %p1834_p12 = scmp.ne.s32.totalorder %s2179_s10, %s1833_s18  ;;  %s1838_s17 = sshll.u32 %s1994_s4, 4  ;;  %s1839_s17 = int_to_ptr.vmem [resolvable:$false] %s1838_s17 }
  0x69   : > { %s1840_s19 = scalar_lea.vmem %s1839_s17, 2048  ;;  %p1841_p4 = scmp.lt.s32.totalorder %s2179_s10, %s1839_s17 }
  0x6a   : > { %p1836_p1 = pnand %p1834_p12, %p1820_p0  ;;  %p1842_p13 = scmp.lt.s32.totalorder %s1840_s19, %s1833_s18 }
  0x6c   : > { %p1837_p5 = pneg %p1836_p1  ;;  %p1843_p6 = por %p1842_p13, %p1841_p4 }
  0x6e   : > { %p1844_p10 = pnand %p1843_p6, %p1837_p5 }
  0x70   : > { %1847 = shalt.err (!%p1844_p10)
}
  0x71   : > { %s2525_s21 = smov 4   ;;  %s2526_s22 = smov 64  }
  0x72   : > { %1685 = dma.hbm_to_vmem [thread:$0]  (!%p2181_p11), %s2177_s11, 1024, %s2179_s10, %s2192_s2, %s2526_s22, %s2526_s22, %s2525_s21  }
  0x73   : > { %s290_s23 = sand.u32 1, %s1988_s27   ;;  %s1848_s14 = scalar_lea.hbm %s2188_s20, 1024 }
  0x74   : > { %s2227_s15 = scalar_lea.sflag [#allocation6], %s290_s23  ;;  %p1849_p4 = scmp.ne.s32.totalorder %s2188_s20, %s1848_s14 }
  0x75   : > { %s1853_s17 = scalar_lea.hbm %s2497_s1, 2048  ;;  %p1854_p3 = scmp.lt.u32.totalorder %s2188_s20, %s2497_s1 }
  0x76   : > { %p1851_p5 = pnand %p1849_p4, %p1820_p0  ;;  %p1855_p7 = scmp.lt.u32.totalorder %s1853_s17, %s1848_s14 }
  0x77   : > { %p1857_p12 = scmp.lt.u32.totalorder %s1848_s14, %s2188_s20 }
  0x78   : > { %p1852_p2 = pneg %p1851_p5  ;;  %p1856_p9 = por %p1855_p7, %p1854_p3 }
  0x7a   : > { %p1858_p1 = por %p1857_p12, %p1856_p9 }
  0x7c   : > { %p1859_p13 = pnand %p1858_p1, %p1852_p2 }
  0x7e   : > { %1862 = shalt.err (!%p1859_p13)
}
  0x7f   : > { %s1863_s2 = scalar_lea.vmem %s2224_s29, 1024  ;;  %s1995_s11 = smov [#allocation5]  }
  0x80   : > { %p1864_p6 = scmp.ne.s32.totalorder %s2224_s29, %s1863_s2  ;;  %s1868_s10 = sshll.u32 %s1995_s11, 4  ;;  %s1869_s10 = int_to_ptr.vmem [resolvable:$false] %s1868_s10 }
  0x81   : > { %s1870_s0 = scalar_lea.vmem %s1869_s10, 2048  ;;  %p1871_p5 = scmp.lt.s32.totalorder %s2224_s29, %s1869_s10 }
  0x82   : > { %p1866_p10 = pnand %p1864_p6, %p1820_p0  ;;  %p1872_p3 = scmp.lt.s32.totalorder %s1870_s0, %s1863_s2 }
  0x84   : > { %p1867_p4 = pneg %p1866_p10  ;;  %p1873_p7 = por %p1872_p3, %p1871_p5 }
  0x86   : > { %p1874_p9 = pnand %p1873_p7, %p1867_p4 }
  0x88   : > { %1877 = shalt.err (!%p1874_p9)
}
  0x89   : > { %1688 = dma.hbm_to_vmem [thread:$0]  (!%p2181_p11), %s2188_s20, 1024, %s2224_s29, %s2227_s15, %s2526_s22, %s2526_s22, %s2525_s21  }
  0x8a   : > { %313 = sbr.rel (%p2081_p8) target bundleno = 841 (0x349), region = 40  ;;  %s2259_s23 = sand.u32 (!%p2081_p8), 1, %s1980_s25  }
  0x8b   : > { %s2262_s14 = sshll.u32 (!%p2081_p8), %s2259_s23, 6  ;;  %s316_s12 = scalar_lea.sflag (!%p2081_p8), [#allocation3], %s2259_s23 }
  0x8c   : > { %s2266_s18 = scalar_lea.vmem (!%p2081_p8), [#allocation2], %s2262_s14  ;;  %p2527_p0 = scmp.ne.s32.totalorder (!%p2081_p8), %s2514_s30, 0 }
  0x91   : > { %1951 = dma.done.wait (%p2527_p0), %s316_s12, 1024  }
  0x92   : > { %1953 = vsyncadd (%p2527_p0), %s316_s12, 4294966272  ;;  %s324_s9 = sand.u32 1, %s2062_s28   ;;  %s2274_s20 = scalar_lea.vmem [#allocation5], %s2262_s14 }
  0x93   : > { %s325_s29 = scalar_lea.sflag [#allocation6], %s324_s9 }
  0x94   : > { %1955 = dma.done.wait (%p2527_p0), %s325_s29, 1024  }
  0x95   : > { %1957 = vsyncadd (%p2527_p0), %s325_s29, 4294966272  ;;  %p2528_p8 = scmp.eq.s32.totalorder %s2062_s28, 0 }
  0x97   : > { %1959 = dma.done.wait (%p2528_p8), [#allocation6], 512   ;;  %p2529_p11 = pmov %p2528_p8 }
  0x98   : > { %p2530_p2 = pmov %p2528_p8 }
  0x99   : > { %1961 = vsyncadd (%p2529_p11), [#allocation6], 4294966784 }
  0x9a   : > { %1963 = dma.done.wait (%p2530_p2), [#allocation9], 128   ;;  %p2531_p12 = pmov %p2530_p2 }
  0x9b   : > { %v1742_v0 = vld [vmem:[%s2266_s18] sm:$0xff]   ;;  %v1744_v2 = vld [vmem:[%s2266_s18 + $0x8] sm:$0xff]   ;;  %v1746_v4 = vld [vmem:[%s2266_s18 + $0x10] sm:$0xff]   ;;  %s2305_s30 = scalar_lea.vmem [#allocation10], %s2262_s14  ;;  %s2309_s21 = scalar_lea.vmem [#allocation11], %s2262_s14  ;;  %vm731_vm0 = vcmask 523264  }
  0x9c   : > { %1965 = vsyncadd (%p2531_p12), [#allocation9], 4294967168  ;;  %v1743_v1 = vld [vmem:[%s2274_s20] sm:$0xff]   ;;  %1543 = vmatprep.subr.bf16.mxu0 %v1742_v0  ;;  %v1745_v3 = vld [vmem:[%s2274_s20 + $0x8] sm:$0xff]   ;;  %s1212_s4 = sshll.u32 %s2305_s30, 4  ;;  %s1227_s17 = sshll.u32 %s2309_s21, 4  ;;  %s2367_s4 = int_to_ptr.vmem [resolvable:$true] %s1212_s4  ;;  %s2369_s17 = int_to_ptr.vmem [resolvable:$true] %s1227_s17 }
  0x9d   : > { %1567 = vmatprep.subr.bf16.mxu1 %v1743_v1  ;;  %1544 = vmatpush3.bf16.xpose.msra.mxu0 %v1742_v0  ;;  %v1747_v5 = vld [vmem:[%s2274_s20 + $0x10] sm:$0xff]   ;;  %v1748_v6 = vld [vmem:[%s2266_s18 + $0x18] sm:$0xff]   ;;  %v1758_v7 = vld [vmem:[#allocation7] sm:$0xff]   ;;  %s1479_s19 = sshll.u32 %s2062_s28, 7  ;;  %s1190_s0 = scalar_lea.sflag [#allocation4], %s2259_s23 }
  0x9e   : > { %1568 = vmatpush3.bf16.xpose.msra.mxu1 %v1743_v1  ;;  %1545 = vmatprep.subr.bf16.mxu0 %v1744_v2  ;;  %v1749_v8 = vld [vmem:[%s2274_s20 + $0x18] sm:$0xff]   ;;  %v1750_v9 = vld [vmem:[%s2266_s18 + $0x20] sm:$0xff]   ;;  %v1752_v11 = vld [vmem:[%s2266_s18 + $0x28] sm:$0xff]   ;;  %s2377_s10 = scalar_lea.hbm %s2501_s5, %s1479_s19  ;;  %s1878_s14 = scalar_lea.vmem %s2367_s4, 1024 }
  0x9f   : > { %1569 = vmatprep.subr.bf16.mxu1 %v1745_v3  ;;  %1559 = vmatprep.mubr.bf16.mxu0 %v1758_v7  ;;  %v1751_v10 = vld [vmem:[%s2274_s20 + $0x20] sm:$0xff]   ;;  %v1753_v12 = vld [vmem:[%s2274_s20 + $0x28] sm:$0xff]   ;;  %v1754_v13 = vld [vmem:[%s2266_s18 + $0x30] sm:$0xff]   ;;  %p1879_p1 = scmp.ne.s32.totalorder %s2367_s4, %s1878_s14  ;;  %p2532_p13 = scmp.ne.s32.totalorder %s2521_s16, 0 }
  0xa0   : > { %1583 = vmatprep.mubr.bf16.mxu1 %v1758_v7  ;;  %v1755_v14 = vld [vmem:[%s2274_s20 + $0x30] sm:$0xff]   ;;  %v1756_v15 = vld [vmem:[%s2266_s18 + $0x38] sm:$0xff]   ;;  %v1759_v17 = vld [vmem:[#allocation7 + $0x8] sm:$0xff]   ;;  %s1996_s12 = smov [#allocation10]  }
  0xa1   : > { %v1757_v16 = vld [vmem:[%s2274_s20 + $0x38] sm:$0xff]   ;;  %v1760_v18 = vld [vmem:[#allocation7 + $0x10] sm:$0xff]   ;;  %v432_v36 = vld [vmem:[#allocation8] sm:$0x1f]  ;;  %p1880_p6 = pnand %p1879_p1, %p2532_p13  ;;  %s1882_s18 = sshll.u32 %s1996_s12, 4  ;;  %s1883_s18 = int_to_ptr.vmem [resolvable:$false] %s1882_s18 }
  0xa2   : > { %v1761_v19 = vld [vmem:[#allocation7 + $0x18] sm:$0xff]   ;;  %v431_v37 = vld [vmem:[%s2499_s3] sm:$0x1f]  ;;  %s1884_s9 = scalar_lea.vmem %s1883_s18, 2048  ;;  %p1885_p4 = scmp.lt.s32.totalorder %s2367_s4, %s1883_s18 }
  0xa3   : > { %p1881_p10 = pneg %p1880_p6  ;;  %p1886_p5 = scmp.lt.s32.totalorder %s1884_s9, %s1878_s14 }
  0xa5   : > { %1546 = vmatpush3.bf16.xpose.msra.mxu0 %v1744_v2  ;;  %p1887_p3 = por %p1886_p5, %p1885_p4 }
  0xa6   : > { %1570 = vmatpush3.bf16.xpose.msra.mxu1 %v1745_v3  ;;  %1547 = vmatprep.subr.bf16.mxu0 %v1746_v4 }
  0xa7   : > { %1571 = vmatprep.subr.bf16.mxu1 %v1747_v5  ;;  %p1888_p7 = pnand %p1887_p3, %p1881_p10 }
  0xad   : > { %1548 = vmatpush3.bf16.xpose.msra.mxu0 %v1746_v4 }
  0xae   : > { %1572 = vmatpush3.bf16.xpose.msra.mxu1 %v1747_v5  ;;  %1549 = vmatprep.subr.bf16.mxu0 %v1748_v6 }
  0xaf   : > { %1573 = vmatprep.subr.bf16.mxu1 %v1749_v8 }
  0xb5   : > { %1550 = vmatpush3.bf16.xpose.msra.mxu0 %v1748_v6 }
  0xb6   : > { %1574 = vmatpush3.bf16.xpose.msra.mxu1 %v1749_v8  ;;  %1551 = vmatprep.subr.bf16.mxu0 %v1750_v9 }
  0xb7   : > { %1575 = vmatprep.subr.bf16.mxu1 %v1751_v10 }
  0xbd   : > { %1552 = vmatpush3.bf16.xpose.msra.mxu0 %v1750_v9 }
  0xbe   : > { %1576 = vmatpush3.bf16.xpose.msra.mxu1 %v1751_v10  ;;  %1553 = vmatprep.subr.bf16.mxu0 %v1752_v11 }
  0xbf   : > { %1577 = vmatprep.subr.bf16.mxu1 %v1753_v12 }
  0xc5   : > { %1554 = vmatpush3.bf16.xpose.msra.mxu0 %v1752_v11 }
  0xc6   : > { %1578 = vmatpush3.bf16.xpose.msra.mxu1 %v1753_v12  ;;  %1555 = vmatprep.subr.bf16.mxu0 %v1754_v13 }
  0xc7   : > { %1579 = vmatprep.subr.bf16.mxu1 %v1755_v14 }
  0xcd   : > { %1556 = vmatpush3.bf16.xpose.msra.mxu0 %v1754_v13 }
  0xce   : > { %1580 = vmatpush3.bf16.xpose.msra.mxu1 %v1755_v14  ;;  %1557 = vmatprep.subr.bf16.mxu0 %v1756_v15 }
  0xcf   : > { %1581 = vmatprep.subr.bf16.mxu1 %v1757_v16 }
  0xd5   : > { %1558 = vmatpush3.bf16.xpose.msra.mxu0 %v1756_v15 }
  0xd6   : > { %1582 = vmatpush3.bf16.xpose.msra.mxu1 %v1757_v16  ;;  %1617 = vmatprep.subr.msk.mxu0 %vm731_vm0, %v431_v37 }
  0xd7   : > { %1591 = vmatprep.subr.msk.mxu1 %vm731_vm0, %v432_v36 }
  0xdc   : > { %1560 = vmatmul.mubr.bf16.vlgmr.msra.gmra.mrb[0].mxu0 %v1759_v17 }
  0xdd   : > { %1584 = vmatmul.mubr.bf16.vlgmr.msra.gmra.mrb[0].mxu1 %v1759_v17  ;;  %1563 = vmatprep.mubr.bf16.mxu0 %v1760_v18 }
  0xde   : > { %1587 = vmatprep.mubr.bf16.mxu1 %v1760_v18  ;;  %1592 = vmatpush3.xpose.msk.msra.mxu1 %vm731_vm0, %v432_v36 }
  0xdf   : > { %1618 = vmatpush3.xpose.msk.msra.mxu0 %vm731_vm0, %v431_v37 }
  0xe4   : > { %1564 = vmatmul.mubr.bf16.gmra.mrb[4].mxu0 %v1761_v19 }
  0xe5   : > { %1588 = vmatmul.mubr.bf16.gmra.mrb[4].mxu1 %v1761_v19 }
 0x1af   : > { %v1561_v20 = vpop.f32.mrb[0].mxu0 }
 0x1b0   : > { %v572_v21 = vmax.f32 %v1561_v20, 0.0  ;;  %v1585_v22 = vpop.f32.mrb[0].mxu1  ;;  %v539_v23 = vpop.f32.mrb[1].mxu0 }
 0x1b1   : > { %v693_v24 = vmax.f32 %v1585_v22, 0.0  ;;  %v570_v25 = vmax.f32 %v539_v23, 0.0  ;;  %v660_v26 = vpop.f32.mrb[1].mxu1  ;;  %v1562_v27 = vpop.f32.mrb[2].mxu0 }
 0x1b2   : > { %1158 = vst [vmem:[%s2305_s30 + $0x10] sm:$0xff] %v572_v21  ;;  %v691_v28 = vmax.f32 %v660_v26, 0.0  ;;  %v573_v29 = vmax.f32 %v1562_v27, 0.0  ;;  %v1586_v30 = vpop.f32.mrb[2].mxu1  ;;  %v542_v31 = vpop.f32.mrb[3].mxu0 }
 0x1b3   : > { %1166 = vst [vmem:[%s2309_s21 + $0x10] sm:$0xff] %v693_v24  ;;  %1156 = vst [vmem:[%s2305_s30] sm:$0xff] %v570_v25  ;;  %v694_v32 = vmax.f32 %v1586_v30, 0.0  ;;  %v571_v33 = vmax.f32 %v542_v31, 0.0  ;;  %v663_v34 = vpop.f32.mrb[3].mxu1  ;;  %928 = vxpose.xlu1.b32.start [1/8] (short) %v570_v25, 128 }
 0x1b4   : > { %1164 = vst [vmem:[%s2309_s21] sm:$0xff] %v691_v28  ;;  %1159 = vst [vmem:[%s2305_s30 + $0x18] sm:$0xff] %v573_v29  ;;  %v692_v35 = vmax.f32 %v663_v34, 0.0  ;;  %699 = vxpose.xlu0.b32.start [1/8] (short) %v691_v28, 128 }
 0x1b5   : > { %1167 = vst [vmem:[%s2309_s21 + $0x18] sm:$0xff] %v694_v32  ;;  %1157 = vst [vmem:[%s2305_s30 + $0x8] sm:$0xff] %v571_v33 }
 0x1b6   : > { %1165 = vst [vmem:[%s2309_s21 + $0x8] sm:$0xff] %v692_v35 }
 0x1b7   : > { %929 = vxpose.xlu1.b32.cont [2/8] (short) %v571_v33, 128  ;;  %v1565_v38 = vpop.f32.mrb[4].mxu0 }
 0x1b8   : > { %700 = vxpose.xlu0.b32.cont [2/8] (short) %v692_v35, 128  ;;  %v576_v39 = vmax.f32 %v1565_v38, 0.0  ;;  %v1589_v40 = vpop.f32.mrb[4].mxu1  ;;  %v555_v41 = vpop.f32.mrb[5].mxu0 }
 0x1b9   : > { %v697_v42 = vmax.f32 %v1589_v40, 0.0  ;;  %v574_v43 = vmax.f32 %v555_v41, 0.0  ;;  %v676_v44 = vpop.f32.mrb[5].mxu1  ;;  %v1566_v45 = vpop.f32.mrb[6].mxu0 }
 0x1ba   : > { %1162 = vst [vmem:[%s2305_s30 + $0x30] sm:$0xff] %v576_v39  ;;  %v695_v46 = vmax.f32 %v676_v44, 0.0  ;;  %v577_v47 = vmax.f32 %v1566_v45, 0.0  ;;  %v1590_v48 = vpop.f32.mrb[6].mxu1  ;;  %v558_v49 = vpop.f32.mrb[7].mxu0 }
 0x1bb   : > { %930 = vxpose.xlu1.b32.cont [3/8] (short) %v572_v21, 128  ;;  %1170 = vst [vmem:[%s2309_s21 + $0x30] sm:$0xff] %v697_v42  ;;  %1160 = vst [vmem:[%s2305_s30 + $0x20] sm:$0xff] %v574_v43  ;;  %v698_v50 = vmax.f32 %v1590_v48, 0.0  ;;  %v679_v51 = vpop.f32.mrb[7].mxu1  ;;  %v575_v52 = vmax.f32 %v558_v49, 0.0 }
 0x1bc   : > { %701 = vxpose.xlu0.b32.cont [3/8] (short) %v693_v24, 128  ;;  %1168 = vst [vmem:[%s2309_s21 + $0x20] sm:$0xff] %v695_v46  ;;  %1163 = vst [vmem:[%s2305_s30 + $0x38] sm:$0xff] %v577_v47  ;;  %v696_v53 = vmax.f32 %v679_v51, 0.0 }
 0x1bd   : > { %1171 = vst [vmem:[%s2309_s21 + $0x38] sm:$0xff] %v698_v50  ;;  %1161 = vst [vmem:[%s2305_s30 + $0x28] sm:$0xff] %v575_v52 }
 0x1be   : > { %1169 = vst [vmem:[%s2309_s21 + $0x28] sm:$0xff] %v696_v53 }
 0x1bf   : > { %931 = vxpose.xlu1.b32.cont [4/8] (short) %v573_v29, 128 }
 0x1c0   : > { %702 = vxpose.xlu0.b32.cont [4/8] (short) %v694_v32, 128 }
 0x1c3   : > { %932 = vxpose.xlu1.b32.cont [5/8] (short) %v574_v43, 128 }
 0x1c4   : > { %703 = vxpose.xlu0.b32.cont [5/8] (short) %v695_v46, 128 }
 0x1c7   : > { %933 = vxpose.xlu1.b32.cont [6/8] (short) %v575_v52, 128 }
 0x1c8   : > { %704 = vxpose.xlu0.b32.cont [6/8] (short) %v696_v53, 128 }
 0x1cb   : > { %934 = vxpose.xlu1.b32.cont [7/8] (short) %v576_v39, 128 }
 0x1cc   : > { %705 = vxpose.xlu0.b32.cont [7/8] (short) %v697_v42, 128 }
 0x1cf   : > { %935 = vxpose.xlu1.b32.end [8/8] (short) %v577_v47, 128 }
 0x1d0   : > { %706 = vxpose.xlu0.b32.end [8/8] (short) %v698_v50, 128 }
 0x233   : > { %v944_v54 = vpop.trf.xlu1 }
 0x234   : > { %v715_v55 = vpop.trf.xlu0  ;;  %1619 = vmatprep.mubr.msk.f32.mxu0 %vm731_vm0, %v944_v54 }
 0x235   : > { %1593 = vmatprep.mubr.msk.f32.mxu1 %vm731_vm0, %v715_v55 }
 0x237   : > { %v945_v56 = vpop.trf.xlu1 }
 0x238   : > { %v716_v57 = vpop.trf.xlu0  ;;  %1620 = vmatmul.mubr.msk.f32.vlgmr.msra.gmra.mrb[8].mxu0 %vm731_vm0, %v945_v56 }
 0x239   : > { %1594 = vmatmul.mubr.msk.f32.vlgmr.msra.gmra.mrb[8].mxu1 %vm731_vm0, %v716_v57 }
 0x23b   : > { %v946_v58 = vpop.trf.xlu1 }
 0x23c   : > { %v717_v59 = vpop.trf.xlu0  ;;  %1622 = vmatprep.mubr.msk.f32.mxu0 %vm731_vm0, %v946_v58 }
 0x23d   : > { %1596 = vmatprep.mubr.msk.f32.mxu1 %vm731_vm0, %v717_v59 }
 0x23f   : > { %v947_v60 = vpop.trf.xlu1 }
 0x240   : > { %v718_v61 = vpop.trf.xlu0  ;;  %1623 = vmatmul.mubr.msk.f32.gmra.mrb[10].mxu0 %vm731_vm0, %v947_v60 }
 0x241   : > { %1597 = vmatmul.mubr.msk.f32.gmra.mrb[10].mxu1 %vm731_vm0, %v718_v61 }
 0x243   : > { %v948_v62 = vpop.trf.xlu1 }
 0x244   : > { %v719_v63 = vpop.trf.xlu0  ;;  %1625 = vmatprep.mubr.msk.f32.mxu0 %vm731_vm0, %v948_v62 }
 0x245   : > { %1599 = vmatprep.mubr.msk.f32.mxu1 %vm731_vm0, %v719_v63 }
 0x247   : > { %v949_v0 = vpop.trf.xlu1 }
 0x248   : > { %v720_v1 = vpop.trf.xlu0  ;;  %1626 = vmatmul.mubr.msk.f32.gmra.mrb[12].mxu0 %vm731_vm0, %v949_v0 }
 0x249   : > { %1600 = vmatmul.mubr.msk.f32.gmra.mrb[12].mxu1 %vm731_vm0, %v720_v1 }
 0x24b   : > { %v950_v2 = vpop.trf.xlu1 }
 0x24c   : > { %v721_v3 = vpop.trf.xlu0  ;;  %1628 = vmatprep.mubr.msk.f32.mxu0 %vm731_vm0, %v950_v2 }
 0x24d   : > { %1602 = vmatprep.mubr.msk.f32.mxu1 %vm731_vm0, %v721_v3 }
 0x24f   : > { %v951_v4 = vpop.trf.xlu1 }
 0x250   : > { %v722_v5 = vpop.trf.xlu0  ;;  %1629 = vmatmul.mubr.msk.f32.gmra.mrb[14].mxu0 %vm731_vm0, %v951_v4 }
 0x251   : > { %1603 = vmatmul.mubr.msk.f32.gmra.mrb[14].mxu1 %vm731_vm0, %v722_v5 }
 0x253   : > { %v952_v6 = vpop.trf.xlu1 }
 0x254   : > { %v723_v7 = vpop.trf.xlu0  ;;  %1631 = vmatprep.mubr.msk.f32.mxu0 %vm731_vm0, %v952_v6 }
 0x255   : > { %1605 = vmatprep.mubr.msk.f32.mxu1 %vm731_vm0, %v723_v7 }
 0x257   : > { %v953_v8 = vpop.trf.xlu1 }
 0x258   : > { %v724_v9 = vpop.trf.xlu0  ;;  %1632 = vmatmul.mubr.msk.f32.gmra.mrb[16].mxu0 %vm731_vm0, %v953_v8 }
 0x259   : > { %1606 = vmatmul.mubr.msk.f32.gmra.mrb[16].mxu1 %vm731_vm0, %v724_v9 }
 0x25b   : > { %v954_v10 = vpop.trf.xlu1 }
 0x25c   : > { %v725_v11 = vpop.trf.xlu0  ;;  %1634 = vmatprep.mubr.msk.f32.mxu0 %vm731_vm0, %v954_v10 }
 0x25d   : > { %1608 = vmatprep.mubr.msk.f32.mxu1 %vm731_vm0, %v725_v11 }
 0x25f   : > { %v955_v12 = vpop.trf.xlu1 }
 0x260   : > { %v726_v13 = vpop.trf.xlu0  ;;  %1635 = vmatmul.mubr.msk.f32.gmra.mrb[18].mxu0 %vm731_vm0, %v955_v12 }
 0x261   : > { %1609 = vmatmul.mubr.msk.f32.gmra.mrb[18].mxu1 %vm731_vm0, %v726_v13 }
 0x263   : > { %v956_v14 = vpop.trf.xlu1 }
 0x264   : > { %v727_v15 = vpop.trf.xlu0  ;;  %1637 = vmatprep.mubr.msk.f32.mxu0 %vm731_vm0, %v956_v14 }
 0x265   : > { %1611 = vmatprep.mubr.msk.f32.mxu1 %vm731_vm0, %v727_v15 }
 0x267   : > { %v957_v16 = vpop.trf.xlu1 }
 0x268   : > { %v728_v17 = vpop.trf.xlu0  ;;  %1638 = vmatmul.mubr.msk.f32.gmra.mrb[20].mxu0 %vm731_vm0, %v957_v16 }
 0x269   : > { %1612 = vmatmul.mubr.msk.f32.gmra.mrb[20].mxu1 %vm731_vm0, %v728_v17 }
 0x26b   : > { %v958_v18 = vpop.trf.xlu1 }
 0x26c   : > { %v729_v19 = vpop.trf.xlu0  ;;  %1640 = vmatprep.mubr.msk.f32.mxu0 %vm731_vm0, %v958_v18 }
 0x26d   : > { %1614 = vmatprep.mubr.msk.f32.mxu1 %vm731_vm0, %v729_v19 }
 0x26f   : > { %v959_v20 = vpop.trf.xlu1 }
 0x270   : > { %v730_v21 = vpop.trf.xlu0  ;;  %1641 = vmatmul.mubr.msk.f32.gmra.mrb[22].mxu0 %vm731_vm0, %v959_v20 }
 0x271   : > { %1615 = vmatmul.mubr.msk.f32.gmra.mrb[22].mxu1 %vm731_vm0, %v730_v21 }
 0x272   : > { %1891 = shalt.err (!%p1888_p7)
}
 0x273   : > { %s1892_s29 = scalar_lea.hbm %s2377_s10, 1024  ;;  %s1896_s21 = scalar_lea.hbm %s2501_s5, 2048 }
 0x274   : > { %p1893_p9 = scmp.ne.s32.totalorder %s2377_s10, %s1892_s29  ;;  %p1897_p11 = scmp.lt.u32.totalorder %s2377_s10, %s2501_s5 }
 0x275   : > { %p1898_p2 = scmp.lt.u32.totalorder %s1896_s21, %s1892_s29  ;;  %p1900_p1 = scmp.lt.u32.totalorder %s1892_s29, %s2377_s10 }
 0x276   : > { %p1894_p0 = pnand %p1893_p9, %p2532_p13 }
 0x277   : > { %p1899_p12 = por %p1898_p2, %p1897_p11 }
 0x278   : > { %p1895_p8 = pneg %p1894_p0 }
 0x279   : > { %p1901_p6 = por %p1900_p1, %p1899_p12 }
 0x27b   : > { %p1902_p10 = pnand %p1901_p6, %p1895_p8 }
 0x27d   : > { %1905 = shalt.err (!%p1902_p10)
}
 0x27e   : > { %s1997_s2 = smov 128   ;;  %s1998_s11 = smov 256  }
 0x27f   : > { %s1999_s14 = smov 8   ;;  %s2411_s9 = scalar_lea.hbm %s2502_s6, %s1479_s19 }
 0x280   : > { %1671 = dma.vmem_to_hbm [thread:$0]  (%p2532_p13), %s2367_s4, 1024, %s2377_s10, %s1190_s0, %s1997_s2, %s1998_s11, %s1999_s14  }
 0x281   : > { %s1195_s29 = scalar_lea.sflag [#allocation12], %s2259_s23  ;;  %s1906_s20 = scalar_lea.vmem %s2369_s17, 1024 }
 0x282   : > { %p1907_p4 = scmp.ne.s32.totalorder %s2369_s17, %s1906_s20  ;;  %s2000_s30 = smov [#allocation11]  }
 0x283   : > { %s1910_s21 = sshll.u32 %s2000_s30, 4  ;;  %s1911_s21 = int_to_ptr.vmem [resolvable:$false] %s1910_s21 }
 0x284   : > { %p1908_p5 = pnand %p1907_p4, %p2532_p13  ;;  %s1912_s22 = scalar_lea.vmem %s1911_s21, 2048 }
 0x285   : > { %p1913_p7 = scmp.lt.s32.totalorder %s2369_s17, %s1911_s21  ;;  %p1914_p9 = scmp.lt.s32.totalorder %s1912_s22, %s1906_s20 }
 0x286   : > { %p1909_p3 = pneg %p1908_p5 }
 0x287   : > { %p1915_p0 = por %p1914_p9, %p1913_p7 }
 0x289   : > { %p1916_p8 = pnand %p1915_p0, %p1909_p3 }
 0x28b   : > { %1919 = shalt.err (!%p1916_p8)
}
 0x28c   : > { %s1920_s4 = scalar_lea.hbm %s2411_s9, 1024  ;;  %s1924_s0 = scalar_lea.hbm %s2502_s6, 2048 }
 0x28d   : > { %p1921_p11 = scmp.ne.s32.totalorder %s2411_s9, %s1920_s4  ;;  %p1925_p1 = scmp.lt.u32.totalorder %s2411_s9, %s2502_s6 }
 0x28e   : > { %p1926_p6 = scmp.lt.u32.totalorder %s1924_s0, %s1920_s4  ;;  %p1928_p4 = scmp.lt.u32.totalorder %s1920_s4, %s2411_s9 }
 0x28f   : > { %p1922_p2 = pnand %p1921_p11, %p2532_p13 }
 0x290   : > { %p1927_p10 = por %p1926_p6, %p1925_p1 }
 0x291   : > { %p1923_p12 = pneg %p1922_p2 }
 0x292   : > { %p1929_p5 = por %p1928_p4, %p1927_p10 }
 0x294   : > { %p1930_p3 = pnand %p1929_p5, %p1923_p12 }
 0x296   : > { %1933 = shalt.err (!%p1930_p3)
}
 0x297   : > { %1672 = dma.vmem_to_hbm [thread:$0]  (%p2532_p13), %s2369_s17, 1024, %s2411_s9, %s1195_s29, %s1997_s2, %s1998_s11, %s1999_s14   ;;  %vm1172_vm1 = vcmask 39936  }
 0x298   : > { %s1421_s18 = sshll.u32 %s2062_s28, 4 }
 0x299   : > { %p385_p7 = scmp.lt.s32.totalorder %s1421_s18, 31 }
 0x29b   : > { %s2541_s18 = smov (!%p385_p7, %s1421_s18), 31 }
 0x29c   : > { %s1422_s20 = sshll.u32 %s2541_s18, 3 }
 0x29d   : > { %s2444_s22 = scalar_lea.vmem %s2503_s7, %s1422_s20 }
 0x30b   : > { %v1621_v22 = vpop.f32.mrb[8].mxu0 }
 0x30c   : > { %v1595_v23 = vpop.f32.mrb[8].mxu1  ;;  %v1077_v24 = vpop.f32.mrb[9].mxu0 }
 0x30d   : > { %v1083_v25 = vadd.f32 %v1621_v22, %v1595_v23  ;;  %v849_v26 = vpop.f32.mrb[9].mxu1 }
 0x30e   : > { %v1078_v27 = vadd.f32 %v1077_v24, %v849_v26 }
 0x30f   : > { %1174 = vst.msk [vmem:[%s2444_s22 + $0x8] sm:$0xff] %vm1172_vm1, %v1083_v25 }
 0x310   : > { %1173 = vst.msk [vmem:[%s2444_s22] sm:$0xff] %vm1172_vm1, %v1078_v27 }
 0x313   : > { %v1624_v28 = vpop.f32.mrb[10].mxu0 }
 0x314   : > { %v1598_v29 = vpop.f32.mrb[10].mxu1  ;;  %v1087_v30 = vpop.f32.mrb[11].mxu0 }
 0x315   : > { %v1093_v31 = vadd.f32 %v1624_v28, %v1598_v29  ;;  %v859_v32 = vpop.f32.mrb[11].mxu1 }
 0x316   : > { %v1088_v33 = vadd.f32 %v1087_v30, %v859_v32 }
 0x317   : > { %1176 = vst.msk [vmem:[%s2444_s22 + $0x18] sm:$0xff] %vm1172_vm1, %v1093_v31 }
 0x318   : > { %1175 = vst.msk [vmem:[%s2444_s22 + $0x10] sm:$0xff] %vm1172_vm1, %v1088_v33 }
 0x31b   : > { %v1627_v34 = vpop.f32.mrb[12].mxu0 }
 0x31c   : > { %v1601_v35 = vpop.f32.mrb[12].mxu1  ;;  %v1097_v36 = vpop.f32.mrb[13].mxu0 }
 0x31d   : > { %v1103_v37 = vadd.f32 %v1627_v34, %v1601_v35  ;;  %v869_v38 = vpop.f32.mrb[13].mxu1 }
 0x31e   : > { %v1098_v39 = vadd.f32 %v1097_v36, %v869_v38 }
 0x31f   : > { %1178 = vst.msk [vmem:[%s2444_s22 + $0x28] sm:$0xff] %vm1172_vm1, %v1103_v37 }
 0x320   : > { %1177 = vst.msk [vmem:[%s2444_s22 + $0x20] sm:$0xff] %vm1172_vm1, %v1098_v39 }
 0x323   : > { %v1630_v40 = vpop.f32.mrb[14].mxu0 }
 0x324   : > { %v1604_v41 = vpop.f32.mrb[14].mxu1  ;;  %v1107_v42 = vpop.f32.mrb[15].mxu0 }
 0x325   : > { %v1113_v43 = vadd.f32 %v1630_v40, %v1604_v41  ;;  %v879_v44 = vpop.f32.mrb[15].mxu1 }
 0x326   : > { %v1108_v45 = vadd.f32 %v1107_v42, %v879_v44 }
 0x327   : > { %1180 = vst.msk [vmem:[%s2444_s22 + $0x38] sm:$0xff] %vm1172_vm1, %v1113_v43 }
 0x328   : > { %1179 = vst.msk [vmem:[%s2444_s22 + $0x30] sm:$0xff] %vm1172_vm1, %v1108_v45 }
 0x32b   : > { %v1633_v46 = vpop.f32.mrb[16].mxu0 }
 0x32c   : > { %v1607_v47 = vpop.f32.mrb[16].mxu1  ;;  %v1117_v48 = vpop.f32.mrb[17].mxu0 }
 0x32d   : > { %v1123_v49 = vadd.f32 %v1633_v46, %v1607_v47  ;;  %v889_v50 = vpop.f32.mrb[17].mxu1 }
 0x32e   : > { %v1118_v51 = vadd.f32 %v1117_v48, %v889_v50 }
 0x32f   : > { %1182 = vst.msk [vmem:[%s2444_s22 + $0x48] sm:$0xff] %vm1172_vm1, %v1123_v49 }
 0x330   : > { %1181 = vst.msk [vmem:[%s2444_s22 + $0x40] sm:$0xff] %vm1172_vm1, %v1118_v51 }
 0x333   : > { %v1636_v52 = vpop.f32.mrb[18].mxu0 }
 0x334   : > { %v1610_v53 = vpop.f32.mrb[18].mxu1  ;;  %v1127_v54 = vpop.f32.mrb[19].mxu0 }
 0x335   : > { %v1133_v55 = vadd.f32 %v1636_v52, %v1610_v53  ;;  %v899_v56 = vpop.f32.mrb[19].mxu1 }
 0x336   : > { %v1128_v57 = vadd.f32 %v1127_v54, %v899_v56 }
 0x337   : > { %1184 = vst.msk [vmem:[%s2444_s22 + $0x58] sm:$0xff] %vm1172_vm1, %v1133_v55 }
 0x338   : > { %1183 = vst.msk [vmem:[%s2444_s22 + $0x50] sm:$0xff] %vm1172_vm1, %v1128_v57 }
 0x33b   : > { %v1639_v58 = vpop.f32.mrb[20].mxu0 }
 0x33c   : > { %v1613_v59 = vpop.f32.mrb[20].mxu1  ;;  %v1137_v60 = vpop.f32.mrb[21].mxu0 }
 0x33d   : > { %v1143_v61 = vadd.f32 %v1639_v58, %v1613_v59  ;;  %v909_v62 = vpop.f32.mrb[21].mxu1 }
 0x33e   : > { %v1138_v63 = vadd.f32 %v1137_v60, %v909_v62 }
 0x33f   : > { %1186 = vst.msk [vmem:[%s2444_s22 + $0x68] sm:$0xff] %vm1172_vm1, %v1143_v61 }
 0x340   : > { %1185 = vst.msk [vmem:[%s2444_s22 + $0x60] sm:$0xff] %vm1172_vm1, %v1138_v63 }
 0x343   : > { %v1642_v0 = vpop.f32.mrb[22].mxu0 }
 0x344   : > { %v1616_v1 = vpop.f32.mrb[22].mxu1  ;;  %v1147_v2 = vpop.f32.mrb[23].mxu0 }
 0x345   : > { %v1153_v3 = vadd.f32 %v1642_v0, %v1616_v1  ;;  %v919_v4 = vpop.f32.mrb[23].mxu1 }
 0x346   : > { %v1148_v5 = vadd.f32 %v1147_v2, %v919_v4 }
 0x347   : > { %1188 = vst.msk [vmem:[%s2444_s22 + $0x78] sm:$0xff] %vm1172_vm1, %v1153_v3 }
 0x348   : > { %1187 = vst.msk [vmem:[%s2444_s22 + $0x70] sm:$0xff] %vm1172_vm1, %v1148_v5 }
 0x349 PF: > { %s1246_s28 = sand.u32 1, %s1976_s24   ;;  %p2533_p13 = scmp.ne.s32.totalorder %s2515_s8, 0 }
 0x34a   : > { %p2534_p9 = scmp.ge.s32.totalorder %s1988_s27, 2  ;;  %s1247_s16 = scalar_lea.sflag [#allocation4], %s1246_s28 }
 0x34c   : > { %p1690_p0 = pnand %p2534_p9, %p2533_p13 }
 0x34e   : > { %1967 = dma.done.wait (!%p1690_p0), %s1247_s16, 1024  }
 0x34f   : > { %1969 = vsyncadd (!%p1690_p0), %s1247_s16, 4294966272  ;;  %s1256_s23 = scalar_lea.sflag [#allocation12], %s1246_s28 }
 0x350   : > { %1971 = dma.done.wait (!%p1690_p0), %s1256_s23, 1024  }
 0x351   : > { %1973 = vsyncadd (!%p1690_p0), %s1256_s23, 4294966272  ;;  %s2535_s17 = sld [smem:[#allocation19_spill]]  ;;  %p28_p8 = scmp.ge.s32.totalorder %s2154_s13, 4  }
 0x352   : > { %s2536_s24 = smov %s1980_s25  ;;  %s2537_s25 = smov %s1984_s26 }
 0x353   : > { %s2539_s27 = smov %s2154_s13  ;;  %30 = sbr.rel (!%p28_p8) target bundleno = 14 (0xe), region = 135 }
 0x357   : > { %s2538_s26 = smov %s2535_s17 }
 0x35a   :  { %1269 = vsyncpa [#allocation3], 1 }
 0x35b   :  { %1271 = vsyncpa [#allocation3 + $0x1], 1 }
 0x35c   :  { %1272 = vsyncpa [#allocation6], 1 }
 0x35d   :  { %1274 = vsyncpa [#allocation6 + $0x1], 1 }
 0x35e   :  { %1275 = vsyncpa [#allocation9], 1 }
 0x35f   :  { %1276 = vsyncpa [#allocation4], 1 }
 0x360   :  { %1278 = vsyncpa [#allocation4 + $0x1], 1 }
 0x361   :  { %1279 = vsyncpa [#allocation12], 1 }
 0x362   :  { %1281 = vsyncpa [#allocation12 + $0x1], 1 }

</bundles_post_ra>
